<compile_context>
chip_gen: v7x
topology: tpu7x:2x2x1
jax: 0.10.0
libtpu: 0.0.40
codegen_flags: <defaults>
</compile_context>

<pallas_src>
import jax
import jax.numpy as jnp
from jax import lax
from jax.experimental import pallas as pl
from jax.experimental.pallas import tpu as pltpu


IMAGE_SIZE = 28 * 28   # 784 — fixed by the module's final .view(B, 28, -1)
HIDDEN = 4
BATCH = 16             # SimpleAE's default batch_size


def _simple_ae_kernel(x_ref, we_ref, be_ref, wd_ref, bd_ref, o_ref):
    """Fused encoder + decoder on one batch tile.

    x_ref : (tb, 784) f32   input rows (784 on the lane axis — lane dense)
    we_ref: (H, 784)  f32   encoder weight, native nn.Linear [out, in] layout
    be_ref: (1, H)    f32
    wd_ref: (H, 784)  f32   decoder weight transposed to [in, out] (lane-dense rows)
    bd_ref: (1, 784)  f32
    o_ref : (tb, 784) f32
    """
    x = x_ref[...]                                   # (tb, 784)
    we = we_ref[...]                                 # (H, 784)

    # Encoder: contract the two 784 dims directly: (tb,784) x (H,784) -> (tb,H).
    # Keeps 784 on the lane axis for BOTH operands; no lane-padded (784,4) RHS.
    code = lax.dot_general(
        x, we,
        dimension_numbers=(((1,), (1,)), ((), ())),
        preferred_element_type=jnp.float32,
    ) + be_ref[...]                                  # (tb, H)

    # Decoder: K = H = 4 — far too small to pay the MXU round trip. Unroll into
    # H VPU broadcast-multiply-adds over the (tb, 784) slab (VALU slots are idle).
    wd = wd_ref[...]                                 # (H, 784)
    recon = bd_ref[...]                              # (1, 784), broadcasts up on first add
    for h in range(wd.shape[0]):                     # H is static -> fully unrolled
        recon = recon + code[:, h:h + 1] * wd[h:h + 1, :]

    o_ref[...] = recon.astype(o_ref.dtype)


def simple_ae_forward(x_nchw, w_enc, b_enc, w_dec, b_dec, *,
                      batch_size=BATCH, batch_tile=256):
    """SimpleAE.forward: view(B,1,-1) -> Linear(784,H) -> Linear(H,784) -> view(B,28,-1).

    x_nchw: (B, 1, 28, 28) f32
    w_enc : (H, 784)  PyTorch nn.Linear weight layout [out, in] (used as-is)
    b_enc : (H,)
    w_dec : (784, H)  PyTorch nn.Linear weight layout [out, in]
    b_dec : (784,)
    Returns (B, 28, 28) f32.
    """
    x2d = x_nchw.reshape(batch_size, -1).astype(jnp.float32)       # (B, 784)
    B, D = x2d.shape
    H = w_enc.shape[0]

    we = w_enc.astype(jnp.float32)                   # (H, 784) native layout — no transpose
    be = b_enc.reshape(1, H).astype(jnp.float32)     # (1, H)
    # Decoder weight transposed ONCE so its rows are lane-dense (784 on lanes)
    # for the in-kernel VPU broadcast-FMA decoder.
    wd = w_dec.T.astype(jnp.float32)                 # (H, 784)
    bd = b_dec.reshape(1, D).astype(jnp.float32)     # (1, 784)

    flops = 2 * B * D * H * 2                        # encoder + decoder GEMM-equivalents
    bytes_accessed = 4 * (x2d.size + we.size + be.size + wd.size + bd.size + B * D)
    cost = pl.CostEstimate(flops=flops, transcendentals=0,
                           bytes_accessed=bytes_accessed)

    if B > batch_tile and B % batch_tile == 0:
        # Batch-tiled path: grid over batch tiles; weights/biases resident per step.
        out2d = pl.pallas_call(
            _simple_ae_kernel,
            out_shape=jax.ShapeDtypeStruct((B, D), jnp.float32),
            grid=(B // batch_tile,),
            in_specs=[
                pl.BlockSpec((batch_tile, D), lambda i: (i, 0)),
                pl.BlockSpec((H, D), lambda i: (0, 0)),
                pl.BlockSpec((1, H), lambda i: (0, 0)),
                pl.BlockSpec((H, D), lambda i: (0, 0)),
                pl.BlockSpec((1, D), lambda i: (0, 0)),
            ],
            out_specs=pl.BlockSpec((batch_tile, D), lambda i: (i, 0)),
            compiler_params=pltpu.CompilerParams(
                dimension_semantics=("parallel",),
            ),
            cost_estimate=cost,
        )(x2d, we, be, wd, bd)
    else:
        # Small batch: whole arrays in VMEM, no grid, no pipeline/double-buffer overhead.
        vmem = pl.BlockSpec(memory_space=pltpu.MemorySpace.VMEM)
        out2d = pl.pallas_call(
            _simple_ae_kernel,
            out_shape=jax.ShapeDtypeStruct((B, D), jnp.float32),
            in_specs=[vmem, vmem, vmem, vmem, vmem],
            out_specs=vmem,
            cost_estimate=cost,
        )(x2d, we, be, wd, bd)

    # Glue: recovered_input.view(batch_size, 28, -1)
    return out2d.reshape(batch_size, 28, -1)


def _init_params(key, image_size=IMAGE_SIZE, hidden_nodes=HIDDEN):
    """Deterministic init mimicking nn.Linear default (U[-1/sqrt(fan_in), +])."""
    k1, k2, k3, k4 = jax.random.split(key, 4)
    bound_e = 1.0 / (image_size ** 0.5)
    bound_d = 1.0 / (hidden_nodes ** 0.5)
    w_enc = jax.random.uniform(k1, (hidden_nodes, image_size), jnp.float32,
                               minval=-bound_e, maxval=bound_e)
    b_enc = jax.random.uniform(k2, (hidden_nodes,), jnp.float32,
                               minval=-bound_e, maxval=bound_e)
    w_dec = jax.random.uniform(k3, (image_size, hidden_nodes), jnp.float32,
                               minval=-bound_d, maxval=bound_d)
    b_dec = jax.random.uniform(k4, (image_size,), jnp.float32,
                               minval=-bound_d, maxval=bound_d)
    return w_enc, b_enc, w_dec, b_dec


def _reference(x_nchw, w_enc, b_enc, w_dec, b_dec, batch_size):
    x2d = x_nchw.reshape(batch_size, -1)
    code = x2d @ w_enc.T + b_enc
    return (code @ w_dec.T + b_dec).reshape(batch_size, 28, 28)


if __name__ == "__main__":
    key = jax.random.PRNGKey(0)
    k_x, k_x2, k_p = jax.random.split(key, 3)
    w_enc, b_enc, w_dec, b_dec = _init_params(k_p)

    # 1) Small-batch path (no grid, whole arrays in VMEM) — matches module default batch.
    x = jax.random.normal(k_x, (BATCH, 1, 28, 28), jnp.float32)
    out = simple_ae_forward(x, w_enc, b_enc, w_dec, b_dec, batch_size=BATCH)
    out = jax.block_until_ready(out)
    ref = _reference(x, w_enc, b_enc, w_dec, b_dec, BATCH)
    assert out.shape == (BATCH, 28, 28), out.shape
    assert jnp.allclose(out, ref, atol=1e-4, rtol=1e-4), "small-batch mismatch vs reference"

    # 2) Batch-tiled path (grid over batch, "parallel" axis) for larger batches.
    B2 = 256
    x2 = jax.random.normal(k_x2, (B2, 1, 28, 28), jnp.float32)
    out2 = simple_ae_forward(x2, w_enc, b_enc, w_dec, b_dec,
                             batch_size=B2, batch_tile=128)
    out2 = jax.block_until_ready(out2)
    ref2 = _reference(x2, w_enc, b_enc, w_dec, b_dec, B2)
    assert out2.shape == (B2, 28, 28), out2.shape
    assert jnp.allclose(out2, ref2, atol=1e-4, rtol=1e-4), "tiled-path mismatch vs reference"

    print("KERNEL_OK")
</pallas_src>

<mosaic_0001>
module attributes {stable_mosaic.version = 11 : i64} {
  func.func @_simple_ae_kernel(%arg0: memref<16x784xf32, #tpu.memory_space<vmem>>, %arg1: memref<4x784xf32, #tpu.memory_space<vmem>>, %arg2: memref<1x4xf32, #tpu.memory_space<vmem>>, %arg3: memref<4x784xf32, #tpu.memory_space<vmem>>, %arg4: memref<1x784xf32, #tpu.memory_space<vmem>>, %arg5: memref<16x784xf32, #tpu.memory_space<vmem>>) attributes {dimension_semantics = [], scalar_prefetch = 0 : i64, scratch_operands = 0 : i64, tpu.core_type = #tpu.core_type<tc>} {
    %c0 = arith.constant 0 : index
    %c0_0 = arith.constant 0 : index
    %0 = vector.load %arg0[%c0, %c0_0] : memref<16x784xf32, #tpu.memory_space<vmem>>, vector<16x784xf32>
    %c0_1 = arith.constant 0 : index
    %c0_2 = arith.constant 0 : index
    %1 = vector.load %arg1[%c0_1, %c0_2] : memref<4x784xf32, #tpu.memory_space<vmem>>, vector<4x784xf32>
    %cst = arith.constant dense<0.000000e+00> : vector<16x4xf32>
    %2 = tpu.matmul %0, %1, %cst {dimension_numbers = #tpu.dot_dimension_numbers<[1], [1], [0], [0], [0, 0, 1, 0], [], []>} : vector<16x784xf32>, vector<4x784xf32>, vector<16x4xf32> -> vector<16x4xf32>
    %c0_3 = arith.constant 0 : index
    %c0_4 = arith.constant 0 : index
    %3 = vector.load %arg2[%c0_3, %c0_4] : memref<1x4xf32, #tpu.memory_space<vmem>>, vector<1x4xf32>
    %4 = vector.broadcast %3 : vector<1x4xf32> to vector<16x4xf32>
    %5 = arith.addf %2, %4 : vector<16x4xf32>
    %c0_5 = arith.constant 0 : index
    %c0_6 = arith.constant 0 : index
    %6 = vector.load %arg3[%c0_5, %c0_6] : memref<4x784xf32, #tpu.memory_space<vmem>>, vector<4x784xf32>
    %c0_7 = arith.constant 0 : index
    %c0_8 = arith.constant 0 : index
    %7 = vector.load %arg4[%c0_7, %c0_8] : memref<1x784xf32, #tpu.memory_space<vmem>>, vector<1x784xf32>
    %8 = vector.extract_strided_slice %5 {offsets = [0, 0], sizes = [16, 1], strides = [1, 1]} : vector<16x4xf32> to vector<16x1xf32>
    %9 = vector.extract_strided_slice %6 {offsets = [0, 0], sizes = [1, 784], strides = [1, 1]} : vector<4x784xf32> to vector<1x784xf32>
    %10 = vector.broadcast %8 : vector<16x1xf32> to vector<16x784xf32>
    %11 = vector.broadcast %9 : vector<1x784xf32> to vector<16x784xf32>
    %12 = arith.mulf %10, %11 : vector<16x784xf32>
    %13 = vector.broadcast %7 : vector<1x784xf32> to vector<16x784xf32>
    %14 = arith.addf %13, %12 : vector<16x784xf32>
    %15 = vector.extract_strided_slice %5 {offsets = [0, 1], sizes = [16, 1], strides = [1, 1]} : vector<16x4xf32> to vector<16x1xf32>
    %16 = vector.extract_strided_slice %6 {offsets = [1, 0], sizes = [1, 784], strides = [1, 1]} : vector<4x784xf32> to vector<1x784xf32>
    %17 = vector.broadcast %15 : vector<16x1xf32> to vector<16x784xf32>
    %18 = vector.broadcast %16 : vector<1x784xf32> to vector<16x784xf32>
    %19 = arith.mulf %17, %18 : vector<16x784xf32>
    %20 = arith.addf %14, %19 : vector<16x784xf32>
    %21 = vector.extract_strided_slice %5 {offsets = [0, 2], sizes = [16, 1], strides = [1, 1]} : vector<16x4xf32> to vector<16x1xf32>
    %22 = vector.extract_strided_slice %6 {offsets = [2, 0], sizes = [1, 784], strides = [1, 1]} : vector<4x784xf32> to vector<1x784xf32>
    %23 = vector.broadcast %21 : vector<16x1xf32> to vector<16x784xf32>
    %24 = vector.broadcast %22 : vector<1x784xf32> to vector<16x784xf32>
    %25 = arith.mulf %23, %24 : vector<16x784xf32>
    %26 = arith.addf %20, %25 : vector<16x784xf32>
    %27 = vector.extract_strided_slice %5 {offsets = [0, 3], sizes = [16, 1], strides = [1, 1]} : vector<16x4xf32> to vector<16x1xf32>
    %28 = vector.extract_strided_slice %6 {offsets = [3, 0], sizes = [1, 784], strides = [1, 1]} : vector<4x784xf32> to vector<1x784xf32>
    %29 = vector.broadcast %27 : vector<16x1xf32> to vector<16x784xf32>
    %30 = vector.broadcast %28 : vector<1x784xf32> to vector<16x784xf32>
    %31 = arith.mulf %29, %30 : vector<16x784xf32>
    %32 = arith.addf %26, %31 : vector<16x784xf32>
    %c0_9 = arith.constant 0 : index
    %c0_10 = arith.constant 0 : index
    %33 = vector.load %arg5[%c0_9, %c0_10] : memref<16x784xf32, #tpu.memory_space<vmem>>, vector<16x784xf32>
    tpu.vector_store %arg5[%c0_9, %c0_10], %32 {strides = array<i32>} : memref<16x784xf32, #tpu.memory_space<vmem>>, vector<16x784xf32>,
    return
  }
}

</mosaic_0001>

<bundles_post_ra>
// kernel: tpu_custom_call.1
= control target key start
LH: loop header
LB: loop body
LE: loop exit
PB: predicated region body
PF: predicated region fallthrough
CT: control target
= control target key end

     0   :  { %10 = vsyncpa [#allocation3], 0  ;;  %s1311_s0 = inlined_call_operand.hbm [shape: f32[16,784], index: 0, kind: input, shape index: {}]   ;;  %s1312_s1 = inlined_call_operand.hbm [shape: f32[4,784], index: 1, kind: input, shape index: {}]   ;;  %s1313_s2 = inlined_call_operand.vmem [shape: f32[1,4], index: 2, kind: input, shape index: {}]   ;;  %s1314_s3 = inlined_call_operand.hbm [shape: f32[4,784], index: 3, kind: input, shape index: {}]   ;;  %s1315_s4 = inlined_call_operand.vmem [shape: f32[1,784], index: 4, kind: input, shape index: {}]   ;;  %s1316_s5 = inlined_call_operand.hbm [shape: f32[16,784], index: 5, kind: output, shape index: {}]  }
   0x1   :  { %11 = vsyncpa [#allocation6], 0 }
   0x2   :  { %12 = vsyncpa [#allocation4], 0  ;;  %s1011_s18 = smov [#allocation5]   ;;  %s1012_s20 = smov [#allocation2]  }
   0x3   :  { %s31_s19 = sshll.u32 %s1011_s18, 4  ;;  %s18_s21 = sshll.u32 %s1012_s20, 4  ;;  %s32_s19 = int_to_ptr.vmem [resolvable:$true] %s31_s19  ;;  %s1051_s21 = int_to_ptr.vmem [resolvable:$true] %s18_s21 }
   0x4   :  { %s917_s24 = scalar_lea.hbm %s1312_s1, 448 }
   0x5   :  { %p918_p0 = scmp.ne.s32.totalorder %s1312_s1, %s917_s24  ;;  %p921_p1 = scmp.lt.u32.totalorder %s917_s24, %s1312_s1 }
   0x7   :  { %p923_p2 = pnand %p921_p1, %p918_p0 }
   0x9   :  { %926 = shalt.err (!%p923_p2)
}
   0xa   :  { %s927_s29 = scalar_lea.vmem %s32_s19, 448  ;;  %p932_p4 = scmp.lt.s32.totalorder %s32_s19, %s32_s19 }
   0xb   :  { %p928_p3 = scmp.ne.s32.totalorder %s32_s19, %s927_s29  ;;  %p933_p5 = scmp.lt.s32.totalorder %s927_s29, %s927_s29 }
   0xd   :  { %p934_p6 = por %p933_p5, %p932_p4 }
   0xf   :  { %p935_p7 = pnand %p934_p6, %p928_p3 }
  0x11   :  { %938 = shalt.err (!%p935_p7)
}
  0x12   :  { %34 = dma.hbm_to_vmem [thread:$0]  %s1312_s1, 448, %s32_s19, [#allocation6]  }
  0x13   :  { %s939_s9 = scalar_lea.hbm %s1311_s0, 1792 }
  0x14   :  { %p940_p8 = scmp.ne.s32.totalorder %s1311_s0, %s939_s9  ;;  %p943_p9 = scmp.lt.u32.totalorder %s939_s9, %s1311_s0 }
  0x16   :  { %p945_p10 = pnand %p943_p9, %p940_p8 }
  0x18   :  { %948 = shalt.err (!%p945_p10)
}
  0x19   :  { %s949_s14 = scalar_lea.vmem %s1051_s21, 1792  ;;  %p954_p12 = scmp.lt.s32.totalorder %s1051_s21, %s1051_s21 }
  0x1a   :  { %p950_p11 = scmp.ne.s32.totalorder %s1051_s21, %s949_s14  ;;  %p955_p13 = scmp.lt.s32.totalorder %s949_s14, %s949_s14 }
  0x1c   :  { %p956_p0 = por %p955_p13, %p954_p12 }
  0x1e   :  { %p957_p1 = pnand %p956_p0, %p950_p11 }
  0x20   :  { %960 = shalt.err (!%p957_p1)
}
  0x21   :  { %s1013_s1 = smov 896   ;;  %s1014_s15 = smov 56  }
  0x22   :  { %24 = dma.hbm_to_vmem [thread:$0]  %s1311_s0, 1792, %s1051_s21, [#allocation3], %s1013_s1, %s1013_s1, %s1014_s15  }
  0x23   :  { %s1015_s18 = smov [#allocation7]   ;;  %s961_s23 = scalar_lea.hbm %s1314_s3, 448 }
  0x24   :  { %s43_s19 = sshll.u32 %s1015_s18, 4  ;;  %p962_p2 = scmp.ne.s32.totalorder %s1314_s3, %s961_s23  ;;  %s44_s19 = int_to_ptr.vmem [resolvable:$true] %s43_s19 }
  0x25   :  { %p965_p3 = scmp.lt.u32.totalorder %s961_s23, %s1314_s3 }
  0x27   :  { %p967_p4 = pnand %p965_p3, %p962_p2 }
  0x29   :  { %970 = shalt.err (!%p967_p4)
}
  0x2a   :  { %s971_s28 = scalar_lea.vmem %s44_s19, 448  ;;  %p976_p6 = scmp.lt.s32.totalorder %s44_s19, %s44_s19 }
  0x2b   :  { %p972_p5 = scmp.ne.s32.totalorder %s44_s19, %s971_s28  ;;  %p977_p7 = scmp.lt.s32.totalorder %s971_s28, %s971_s28 }
  0x2d   :  { %p978_p8 = por %p977_p7, %p976_p6 }
  0x2f   :  { %p979_p9 = pnand %p978_p8, %p972_p5 }
  0x31   :  { %982 = shalt.err (!%p979_p9)
}
  0x32   :  { %46 = dma.hbm_to_vmem [thread:$0]  %s1314_s3, 448, %s44_s19, [#allocation6]  }
  0x33   :  { %1005 = dma.done.wait [#allocation3], 1792  }
  0x34   :  { %1006 = vsyncadd [#allocation3], 4294965504 }
  0x35   :  { %1007 = dma.done.wait [#allocation6], 896  }
  0x36   :  { %1008 = vsyncadd [#allocation6], 4294966400  ;;  %v73_v0 = vld [vmem:[#allocation5 + $0x8] sm:$0xff]  ;;  %v72_v1 = vld [vmem:[#allocation5] sm:$0xff]  ;;  %vm93_vm0 = vcmask 130048   ;;  %v1016_v21 = vmov 1   ;;  %v421_v42 = vlaneseq }
  0x37   :  { %v61_v2 = vld [vmem:[#allocation2 + $0x18] sm:$0xff]  ;;  %v88_v3 = vcombine.high %v73_v0, %v73_v0  ;;  %v87_v4 = vcombine.high %v72_v1, %v72_v1  ;;  %v59_v5 = vld [vmem:[#allocation2 + $0x8] sm:$0xff]  ;;  %v74_v6 = vld [vmem:[#allocation5 + $0x10] sm:$0xff]  ;;  %908 = vset.pattern.permute.xlu1 %v1016_v21  ;;  %v1017_v22 = vmov 0   ;;  %v1018_v40 = vmov 2  }
  0x38   :  { %241 = vmatprep.mubr.f32.mxu0 %v61_v2  ;;  %166 = vmatprep.mubr.f32.mxu1 %v59_v5  ;;  %v89_v7 = vcombine.high %v74_v6, %v74_v6  ;;  %v75_v8 = vld [vmem:[#allocation5 + $0x18] sm:$0xf]  ;;  %v60_v9 = vld [vmem:[#allocation2 + $0x10] sm:$0xff]  ;;  %v58_v10 = vld [vmem:[#allocation2] sm:$0xff]  ;;  %v1019_v41 = vmov 3   ;;  %v422_v43 = vshrl.u32 %v421_v42, 7 }
  0x39   :  { %177 = vmatprep.subr.mxu0 %v88_v3  ;;  %102 = vmatprep.subr.mxu1 %v87_v4  ;;  %v68_v11 = vld [vmem:[#allocation2 + $0x50] sm:$0xff]  ;;  %v66_v12 = vld [vmem:[#allocation2 + $0x40] sm:$0xff]  ;;  %v67_v13 = vld [vmem:[#allocation2 + $0x48] sm:$0xff] }
  0x3a   :  { %178 = vmatpush1.xpose.msra.mxu0 %v73_v0  ;;  %103 = vmatpush1.xpose.msra.mxu1 %v72_v1  ;;  %v65_v14 = vld [vmem:[#allocation2 + $0x38] sm:$0xff]  ;;  %v63_v15 = vld [vmem:[#allocation2 + $0x28] sm:$0xff]  ;;  %v64_v16 = vld [vmem:[#allocation2 + $0x30] sm:$0xff]  ;;  %v505_v44 = vsub.s32 1, %v422_v43  ;;  %v521_v46 = vsub.s32 5, %v422_v43  ;;  %v423_v50 = vsub.s32 0, %v422_v43 }
  0x3b   :  { %252 = vmatprep.subr.mxu0 %v89_v7  ;;  %884 = vmatprep.subr.msk.mxu1 %vm93_vm0, %v75_v8  ;;  %v62_v17 = vld [vmem:[#allocation2 + $0x20] sm:$0xff]  ;;  %v71_v18 = vld [vmem:[#allocation2 + $0x68] sm:$0xff]  ;;  %v69_v20 = vld [vmem:[#allocation2 + $0x58] sm:$0xff]  ;;  %v427_v51 = vsub.s32 4, %v422_v43 }
  0x3c   :  { %v70_v19 = vld [vmem:[#allocation2 + $0x60] sm:$0xff]  ;;  %907 = vset.pattern.permute.xlu0 %v1017_v22  ;;  %v1104_v45 = vld [vmem:[#allocation7] sm:$0xff]  ;;  %v1106_v47 = vld [vmem:[#allocation7 + $0x8] sm:$0xff] }
  0x3d   :  { %242 = vmatmul.mubr.f32.vlgmr.msra.gmra.mrb[0].mxu0 %v60_v9  ;;  %167 = vmatmul.mubr.f32.vlgmr.msra.gmra.mrb[0].mxu1 %v58_v10  ;;  %v877_v25 = vld [vmem:[%s1313_s2] ss:$0 sm:$0xff]  ;;  %v1110_v49 = vld [vmem:[#allocation7 + $0x18] sm:$0xf]  ;;  %v559_v52 = vrot.slane %v1104_v45, %v505_v44  ;;  %v563_v53 = vrot.slane %v1104_v45, %v521_v46  ;;  %v567_v54 = vrot.slane %v1106_v47, %v505_v44  ;;  %v509_v10 = vsub.s32 2, %v422_v43 }
  0x3e   :  { %253 = vmatpush1.xpose.msra.mxu0 %v74_v6  ;;  %885 = vmatpush3.xpose.msk.msra.mxu1 %vm93_vm0, %v75_v8  ;;  %v1108_v48 = vld [vmem:[#allocation7 + $0x10] sm:$0xff]  ;;  %v571_v55 = vrot.slane %v1106_v47, %v521_v46  ;;  %v583_v58 = vrot.slane %v1110_v49, %v505_v44  ;;  %v424_v59 = vrot.slane %v1104_v45, %v423_v50 }
  0x3f   :  { %246 = vmatprep.mubr.f32.mxu0 %v68_v11  ;;  %171 = vmatprep.mubr.f32.mxu1 %v66_v12  ;;  %v575_v56 = vrot.slane %v1108_v48, %v505_v44  ;;  %v579_v57 = vrot.slane %v1108_v48, %v521_v46  ;;  %v428_v60 = vrot.slane %v1104_v45, %v427_v51  ;;  %v406_v9 = vld [vmem:[%s1315_s4] sm:$0x7f]  ;;  %s1020_s4 = smov [#allocation8]  }
  0x40   :  { %v432_v61 = vrot.slane %v1106_v47, %v423_v50  ;;  %v1122_v62 = vrot.slane %v559_v52, %v505_v44  ;;  %v436_v63 = vrot.slane %v1106_v47, %v427_v51  ;;  %v440_v0 = vrot.slane %v1108_v48, %v423_v50  ;;  %s864_s6 = sshll.u32 %s1020_s4, 4  ;;  %s865_s6 = int_to_ptr.vmem [resolvable:$true] %s864_s6 }
  0x41   :  { %247 = vmatmul.mubr.f32.gmra.mrb[2].mxu0 %v67_v13  ;;  %172 = vmatmul.mubr.f32.gmra.mrb[2].mxu1 %v65_v14  ;;  %v444_v1 = vrot.slane %v1108_v48, %v427_v51  ;;  %v1127_v2 = vrot.slane %v563_v53, %v505_v44  ;;  %v1129_v3 = vrot.slane %v567_v54, %v505_v44  ;;  %v525_v14 = vsub.s32 6, %v422_v43  ;;  %s983_s7 = scalar_lea.vmem %s865_s6, 1792  ;;  %p988_p11 = scmp.lt.s32.totalorder %s865_s6, %s865_s6 }
  0x42   :  { %316 = vmatprep.mubr.f32.mxu0 %v63_v15  ;;  %886 = vmatprep.mubr.msk.f32.mxu1 %vm93_vm0, %v64_v16  ;;  %v1131_v4 = vrot.slane %v571_v55, %v505_v44  ;;  %v448_v5 = vrot.slane %v1110_v49, %v423_v50  ;;  %v1134_v6 = vrot.slane %v575_v56, %v505_v44  ;;  %p984_p10 = scmp.ne.s32.totalorder %s865_s6, %s983_s7  ;;  %p989_p12 = scmp.lt.s32.totalorder %s983_s7, %s983_s7 }
  0x43   :  { %v1136_v7 = vrot.slane %v579_v57, %v505_v44  ;;  %v1138_v8 = vrot.slane %v583_v58, %v505_v44  ;;  %v1143_v11 = vrot.slane %v424_v59, %v423_v50  ;;  %v1145_v12 = vrot.slane %v428_v60, %v423_v50 }
  0x44   :  { %v1147_v13 = vrot.slane %v432_v61, %v423_v50  ;;  %v1149_v15 = vrot.slane %v436_v63, %v423_v50  ;;  %v1151_v16 = vrot.slane %v440_v0, %v423_v50  ;;  %v1159_v21 = vrot.slane %v406_v9, %v505_v44  ;;  %p990_p13 = por %p989_p12, %p988_p11 }
  0x45   :  { %317 = vmatmul.mubr.f32.vlgmr.msra.gmra.mrb[0].mxu0 %v62_v17  ;;  %887 = vmatmul.mubr.msk.f32.vlgmr.msra.gmra.mrb[4].mxu1 %vm93_vm0, %v71_v18  ;;  %v1153_v17 = vrot.slane %v444_v1, %v423_v50  ;;  %v760_v18 = vsub.s32 7, %v422_v43 }
  0x46   :  { %321 = vmatprep.mubr.f32.mxu0 %v70_v19  ;;  %v1155_v19 = vrot.slane %v448_v5, %v423_v50  ;;  %p991_p0 = pnand %p990_p13, %p984_p10 }
  0x49   :  { %322 = vmatmul.mubr.f32.gmra.mrb[2].mxu0 %v69_v20  ;;  %v1157_v20 = vrot.slane %v406_v9, %v423_v50 }
 0x110   :  { %v168_v23 = vpop.f32.mrb[0].mxu1 }
 0x111   :  { %v170_v24 = vpop.f32.mrb[1].mxu1  ;;  %v169_v28 = vadd.f32 %v877_v25, %v168_v23  ;;  %v1161_v23 = vrot.slane %v406_v9, %v509_v10 }
 0x112   :  { %v1163_v24 = vrot.slane %v406_v9, %v427_v51 }
 0x114   :  { %v173_v26 = vpop.f32.mrb[2].mxu1 }
 0x115   :  { %v175_v27 = vpop.f32.mrb[3].mxu1  ;;  %v174_v34 = vadd.f32 %v877_v25, %v173_v26  ;;  %v1165_v25 = vrot.slane %v406_v9, %v521_v46  ;;  %v658_v26 = vrot.slane %v1104_v45, %v509_v10 }
 0x116   :  { %v662_v27 = vrot.slane %v1104_v45, %v525_v14 }
 0x118   :  { %v318_v29 = vpop.f32.mrb[0].mxu0  ;;  %v888_v30 = vpop.f32.mrb[4].mxu1 }
 0x119   :  { %v890_v31 = vadd.f32 %v318_v29, %v169_v28  ;;  %v320_v32 = vpop.f32.mrb[1].mxu0  ;;  %v393_v33 = vpop.f32.mrb[5].mxu1  ;;  %v666_v28 = vrot.slane %v1106_v47, %v509_v10  ;;  %v670_v29 = vrot.slane %v1106_v47, %v525_v14 }
 0x11a   :  { %v682_v32 = vrot.slane %v1110_v49, %v509_v10 }
 0x11b   :  { %v394_v35 = vadd.f32 %v890_v31, %v393_v33  ;;  %v678_v31 = vrot.slane %v1108_v48, %v525_v14  ;;  %v701_v44 = vrot.slane %v666_v28, %v509_v10  ;;  %v705_v46 = vrot.slane %v670_v29, %v509_v10 }
 0x11c   :  { %v323_v36 = vpop.f32.mrb[2].mxu0  ;;  %v717_v51 = vrot.slane %v682_v32, %v509_v10 }
 0x11d   :  { %v892_v37 = vadd.f32 %v323_v36, %v174_v34  ;;  %v325_v38 = vpop.f32.mrb[3].mxu0  ;;  %549 = vperm.xlu1 %908, %v394_v35   ;;  %409 = vperm.xlu0 %907, %v394_v35   ;;  %v761_v34 = vrot.slane %v1104_v45, %v760_v18  ;;  %v769_v36 = vrot.slane %v1106_v47, %v760_v18 }
 0x11e   :  { %v777_v38 = vrot.slane %v1108_v48, %v760_v18 }
 0x11f   :  { %v399_v39 = vadd.f32 %v892_v37, %v888_v30  ;;  %v674_v30 = vrot.slane %v1108_v48, %v509_v10 }
 0x121   :  { %553 = vperm.xlu1 %908, %v399_v39   ;;  %909 = vset.pattern.permute.xlu0 %v1018_v40  ;;  %v709_v50 = vrot.slane %v674_v30, %v509_v10 }
 0x122   :  { %648 = vperm.xlu0 %909, %v394_v35  }
 0x125   :  { %911 = vset.pattern.permute.xlu1 %v1018_v40  ;;  %v1182_v40 = vrot.slane %v406_v9, %v525_v14 }
 0x126   :  { %652 = vperm.xlu1 %911, %v399_v39   ;;  %910 = vset.pattern.permute.xlu0 %v1017_v22  ;;  %v513_v22 = vsub.s32 3, %v422_v43  ;;  %v697_v43 = vrot.slane %v662_v27, %v509_v10 }
 0x127   :  { %414 = vperm.xlu0 %910, %v399_v39  }
 0x128   :  { %v757_v33 = vrot.slane %v1104_v45, %v513_v22  ;;  %v773_v37 = vrot.slane %v1108_v48, %v513_v22  ;;  %v781_v42 = vrot.slane %v1110_v49, %v513_v22  ;;  %v713_v45 = vrot.slane %v678_v31, %v509_v10 }
 0x129   :  { %v1191_v55 = vrot.slane %v769_v36, %v513_v22  ;;  %v1195_v57 = vrot.slane %v777_v38, %v513_v22 }
 0x12a   :  { %912 = vset.pattern.permute.xlu1 %v1019_v41  ;;  %v1185_v52 = vrot.slane %v757_v33, %v513_v22  ;;  %v1193_v56 = vrot.slane %v773_v37, %v513_v22  ;;  %v1200_v60 = vrot.slane %v781_v42, %v513_v22 }
 0x12b   :  { %747 = vperm.xlu1 %912, %v394_v35   ;;  %913 = vset.pattern.permute.xlu0 %v1019_v41  ;;  %v765_v35 = vrot.slane %v1106_v47, %v513_v22  ;;  %v693_v41 = vrot.slane %v658_v26, %v509_v10  ;;  %v1187_v47 = vrot.slane %v761_v34, %v513_v22 }
 0x12c   :  { %751 = vperm.xlu0 %913, %v399_v39   ;;  %v1180_v39 = vrot.slane %v406_v9, %v513_v22 }
 0x12d   :  { %v1189_v48 = vrot.slane %v765_v35, %v513_v22 }
 0x19c   :  { %v550_v53 = vpop.permute.xlu1 %549  ;;  %v410_v54 = vpop.permute.xlu0 %409 }
 0x19d   :  { %v619_v49 = vmul.f32 %v1122_v62, %v550_v53  ;;  %v620_v58 = vmul.f32 %v1127_v2, %v550_v53  ;;  %v621_v59 = vmul.f32 %v1129_v3, %v550_v53  ;;  %v622_v61 = vmul.f32 %v1131_v4, %v550_v53 }
 0x19e   :  { %v623_v63 = vmul.f32 %v1134_v6, %v550_v53  ;;  %v624_v0 = vmul.f32 %v1136_v7, %v550_v53  ;;  %v484_v1 = vmul.f32 %v1143_v11, %v410_v54  ;;  %v485_v5 = vmul.f32 %v1145_v12, %v410_v54 }
 0x19f   :  { %v486_v9 = vmul.f32 %v1147_v13, %v410_v54  ;;  %v487_v10 = vmul.f32 %v1149_v15, %v410_v54  ;;  %v488_v14 = vmul.f32 %v1151_v16, %v410_v54  ;;  %v625_v18 = vmul.f32 %v1138_v8, %v550_v53 }
 0x1a0   :  { %v489_v22 = vmul.f32 %v1153_v17, %v410_v54  ;;  %v490_v26 = vmul.f32 %v1155_v19, %v410_v54  ;;  %v534_v27 = vadd.f32 %v1157_v20, %v484_v1  ;;  %v554_v28 = vpop.permute.xlu1 %553  ;;  %v535_v29 = vadd.f32 %v1159_v21, %v485_v5 }
 0x1a1   :  { %v536_v30 = vadd.f32 %v1161_v23, %v486_v9  ;;  %v537_v31 = vadd.f32 %v1180_v39, %v487_v10  ;;  %v538_v32 = vadd.f32 %v1163_v24, %v488_v14  ;;  %v649_v33 = vpop.permute.xlu0 %648  ;;  %v626_v36 = vmul.f32 %v1122_v62, %v554_v28 }
 0x1a2   :  { %v539_v34 = vadd.f32 %v1165_v25, %v489_v22  ;;  %v540_v35 = vadd.f32 %v1182_v40, %v490_v26  ;;  %v1222_v37 = vmul.f32 %v1127_v2, %v554_v28  ;;  %v1225_v38 = vmul.f32 %v1129_v3, %v554_v28 }
 0x1a3   :  { %v1228_v42 = vmul.f32 %v1131_v4, %v554_v28  ;;  %v1231_v53 = vmul.f32 %v1134_v6, %v554_v28  ;;  %v1234_v54 = vmul.f32 %v1136_v7, %v554_v28  ;;  %v1237_v1 = vmul.f32 %v1138_v8, %v554_v28 }
 0x1a4   :  { %v718_v5 = vmul.f32 %v693_v41, %v649_v33  ;;  %v719_v62 = vmul.f32 %v697_v43, %v649_v33  ;;  %v720_v9 = vmul.f32 %v701_v44, %v649_v33  ;;  %v721_v2 = vmul.f32 %v705_v46, %v649_v33 }
 0x1a5   :  { %1317 = vst [vmem:[#allocation12_spill] sm:$0xff] %v1231_v53  ;;  %1318 = vst [vmem:[#allocation13_spill] sm:$0xff] %v1234_v54  ;;  %v722_v10 = vmul.f32 %v709_v50, %v649_v33  ;;  %v723_v14 = vmul.f32 %v713_v45, %v649_v33  ;;  %v724_v3 = vmul.f32 %v717_v51, %v649_v33  ;;  %v653_v22 = vpop.permute.xlu1 %652 }
 0x1a6   :  { %1319 = vst [vmem:[#allocation14_spill] sm:$0xff] %v1237_v1  ;;  %v1239_v26 = vmul.f32 %v693_v41, %v653_v22  ;;  %v1241_v4 = vmul.f32 %v697_v43, %v653_v22  ;;  %v1243_v6 = vmul.f32 %v701_v44, %v653_v22  ;;  %v1245_v53 = vmul.f32 %v705_v46, %v653_v22  ;;  %v415_v7 = vpop.permute.xlu0 %414 }
 0x1a7   :  { %v1247_v54 = vmul.f32 %v709_v50, %v653_v22  ;;  %v1249_v8 = vmul.f32 %v713_v45, %v653_v22  ;;  %v1251_v28 = vmul.f32 %v717_v51, %v653_v22  ;;  %v491_v1 = vmul.f32 %v1143_v11, %v415_v7 }
 0x1a8   :  { %1320 = vst [vmem:[#allocation15_spill] sm:$0xff] %v1245_v53  ;;  %v492_v33 = vmul.f32 %v1145_v12, %v415_v7  ;;  %v493_v41 = vmul.f32 %v1147_v13, %v415_v7  ;;  %v494_v43 = vmul.f32 %v1149_v15, %v415_v7  ;;  %v495_v44 = vmul.f32 %v1151_v16, %v415_v7 }
 0x1a9   :  { %1321 = vst [vmem:[#allocation16_spill] sm:$0xff] %v1249_v8  ;;  %1322 = vst [vmem:[#allocation17_spill] sm:$0xff] %v1251_v28  ;;  %v496_v46 = vmul.f32 %v1153_v17, %v415_v7  ;;  %v497_v53 = vmul.f32 %v1155_v19, %v415_v7  ;;  %v541_v50 = vadd.f32 %v1157_v20, %v491_v1 }
 0x1aa   :  { %v633_v45 = vadd.f32 %v619_v49, %v534_v27  ;;  %v542_v51 = vadd.f32 %v1159_v21, %v492_v33  ;;  %v543_v22 = vadd.f32 %v1161_v23, %v493_v41  ;;  %v544_v11 = vadd.f32 %v1180_v39, %v494_v43  ;;  %v748_v13 = vpop.permute.xlu1 %747 }
 0x1ab   :  { %v545_v12 = vadd.f32 %v1163_v24, %v495_v44  ;;  %v546_v15 = vadd.f32 %v1165_v25, %v496_v46  ;;  %v547_v16 = vadd.f32 %v1182_v40, %v497_v53  ;;  %v634_v28 = vadd.f32 %v620_v58, %v535_v29 }
 0x1ac   :  { %v635_v17 = vadd.f32 %v621_v59, %v536_v30  ;;  %v636_v8 = vadd.f32 %v622_v61, %v537_v31  ;;  %v637_v19 = vadd.f32 %v623_v63, %v538_v32  ;;  %v638_v7 = vadd.f32 %v624_v0, %v539_v34  ;;  %v752_v32 = vpop.permute.xlu0 %751 }
 0x1ad   :  { %v639_v20 = vadd.f32 %v625_v18, %v540_v35  ;;  %v732_v49 = vadd.f32 %v718_v5, %v633_v45  ;;  %v733_v27 = vadd.f32 %v719_v62, %v634_v28  ;;  %v817_v23 = vmul.f32 %v1185_v52, %v748_v13 }
 0x1ae   :  { %v734_v21 = vadd.f32 %v720_v9, %v635_v17  ;;  %v735_v1 = vadd.f32 %v721_v2, %v636_v8  ;;  %v736_v39 = vadd.f32 %v722_v10, %v637_v19  ;;  %v737_v33 = vadd.f32 %v723_v14, %v638_v7  ;;  %v1323_v9 = vld [vmem:[#allocation12_spill] sm:$0xff]  ;;  %v1324_v2 = vld [vmem:[#allocation13_spill] sm:$0xff]  ;;  %v1325_v14 = vld [vmem:[#allocation14_spill] sm:$0xff] }
 0x1af   :  { %v738_v24 = vadd.f32 %v724_v3, %v639_v20  ;;  %v818_v41 = vmul.f32 %v1187_v47, %v748_v13  ;;  %v819_v25 = vmul.f32 %v1189_v48, %v748_v13  ;;  %v820_v40 = vmul.f32 %v1191_v55, %v748_v13  ;;  %v1326_v43 = vld [vmem:[#allocation15_spill] sm:$0xff] }
 0x1b0   :  { %v821_v58 = vmul.f32 %v1193_v56, %v748_v13  ;;  %v822_v59 = vmul.f32 %v1195_v57, %v748_v13  ;;  %v823_v61 = vmul.f32 %v1200_v60, %v748_v13  ;;  %v831_v63 = vadd.f32 %v817_v23, %v732_v49  ;;  %v1327_v46 = vld [vmem:[#allocation16_spill] sm:$0xff]  ;;  %v1328_v45 = vld [vmem:[#allocation17_spill] sm:$0xff] }
 0x1b1   :  { %v640_v0 = vadd.f32 %v626_v36, %v541_v50  ;;  %v832_v18 = vadd.f32 %v818_v41, %v733_v27  ;;  %v833_v29 = vadd.f32 %v819_v25, %v734_v21  ;;  %v834_v30 = vadd.f32 %v820_v40, %v735_v1 }
 0x1b2   :  { %v835_v31 = vadd.f32 %v821_v58, %v736_v39  ;;  %v836_v34 = vadd.f32 %v822_v59, %v737_v33  ;;  %v837_v35 = vadd.f32 %v823_v61, %v738_v24  ;;  %845 = vst [vmem:[#allocation8] sm:$0xff] %v831_v63  ;;  %v641_v53 = vadd.f32 %v1222_v37, %v542_v51 }
 0x1b3   :  { %v642_v5 = vadd.f32 %v1225_v38, %v543_v22  ;;  %846 = vst [vmem:[#allocation8 + $0x8] sm:$0xff] %v832_v18  ;;  %847 = vst [vmem:[#allocation8 + $0x10] sm:$0xff] %v833_v29  ;;  %v643_v62 = vadd.f32 %v1228_v42, %v544_v11  ;;  %v644_v36 = vadd.f32 %v1323_v9, %v545_v12 }
 0x1b4   :  { %848 = vst [vmem:[#allocation8 + $0x18] sm:$0xff] %v834_v30  ;;  %849 = vst [vmem:[#allocation8 + $0x20] sm:$0xff] %v835_v31  ;;  %v645_v10 = vadd.f32 %v1324_v2, %v546_v15  ;;  %v646_v3 = vadd.f32 %v1325_v14, %v547_v16  ;;  %v739_v8 = vadd.f32 %v1239_v26, %v640_v0 }
 0x1b5   :  { %850 = vst [vmem:[#allocation8 + $0x28] sm:$0xff] %v836_v34  ;;  %851 = vst.msk [vmem:[#allocation8 + $0x30] sm:$0xff] %vm93_vm0, %v837_v35  ;;  %v740_v37 = vadd.f32 %v1241_v4, %v641_v53  ;;  %v741_v38 = vadd.f32 %v1243_v6, %v642_v5  ;;  %v824_v28 = vmul.f32 %v1185_v52, %v752_v32 }
 0x1b6   :  { %v742_v44 = vadd.f32 %v1326_v43, %v643_v62  ;;  %v743_v42 = vadd.f32 %v1247_v54, %v644_v36  ;;  %v744_v50 = vadd.f32 %v1327_v46, %v645_v10  ;;  %v745_v51 = vadd.f32 %v1328_v45, %v646_v3 }
 0x1b7   :  { %v825_v22 = vmul.f32 %v1187_v47, %v752_v32  ;;  %v826_v11 = vmul.f32 %v1189_v48, %v752_v32  ;;  %v827_v26 = vmul.f32 %v1191_v55, %v752_v32  ;;  %v828_v4 = vmul.f32 %v1193_v56, %v752_v32 }
 0x1b8   :  { %v829_v52 = vmul.f32 %v1195_v57, %v752_v32  ;;  %v830_v6 = vmul.f32 %v1200_v60, %v752_v32  ;;  %v838_v12 = vadd.f32 %v824_v28, %v739_v8 }
 0x1b9   :  { %v839_v54 = vadd.f32 %v825_v22, %v740_v37  ;;  %v840_v13 = vadd.f32 %v826_v11, %v741_v38  ;;  %v841_v15 = vadd.f32 %v827_v26, %v742_v44  ;;  %v842_v16 = vadd.f32 %v828_v4, %v743_v42 }
 0x1ba   :  { %v843_v17 = vadd.f32 %v829_v52, %v744_v50  ;;  %v844_v19 = vadd.f32 %v830_v6, %v745_v51  ;;  %852 = vst [vmem:[#allocation8 + $0x38] sm:$0xff] %v838_v12 }
 0x1bb   :  { %853 = vst [vmem:[#allocation8 + $0x40] sm:$0xff] %v839_v54  ;;  %854 = vst [vmem:[#allocation8 + $0x48] sm:$0xff] %v840_v13 }
 0x1bc   :  { %855 = vst [vmem:[#allocation8 + $0x50] sm:$0xff] %v841_v15  ;;  %856 = vst [vmem:[#allocation8 + $0x58] sm:$0xff] %v842_v16 }
 0x1bd   :  { %857 = vst [vmem:[#allocation8 + $0x60] sm:$0xff] %v843_v17  ;;  %858 = vst.msk [vmem:[#allocation8 + $0x68] sm:$0xff] %vm93_vm0, %v844_v19 }
 0x1be   :  { %994 = shalt.err (!%p991_p0)
}
 0x1bf   :  { %s995_s10 = scalar_lea.hbm %s1316_s5, 1792 }
 0x1c0   :  { %p996_p1 = scmp.ne.s32.totalorder %s1316_s5, %s995_s10  ;;  %p999_p2 = scmp.lt.u32.totalorder %s995_s10, %s1316_s5 }
 0x1c2   :  { %p1001_p3 = pnand %p999_p2, %p996_p1 }
 0x1c4   :  { %1004 = shalt.err (!%p1001_p3)
}
 0x1c5   :  { %870 = dma.vmem_to_hbm [thread:$0]  %s865_s6, 1792, %s1316_s5, [#allocation4], %s1013_s1, %s1013_s1, %s1014_s15  }
 0x1c6   :  { %1009 = dma.done.wait [#allocation4], 1792  }
 0x1c7   :  { %1010 = vsyncadd [#allocation4], 4294965504 }
 0x1c8   :  { %874 = vsyncpa [#allocation3], 1 }
 0x1c9   :  { %875 = vsyncpa [#allocation6], 1 }
 0x1ca   :  { %876 = vsyncpa [#allocation4], 1 }

</bundles_post_ra>
